<compile_context>
chip_gen: v6e
topology: v6e:2x2x1
jax: 0.10.0
libtpu: 0.0.40
codegen_flags: <defaults>
</compile_context>

<pallas_src>
from functools import partial

import jax
import jax.numpy as jnp
from jax.experimental import pallas as pl
from jax.experimental.pallas import tpu as pltpu

_LANE = 128


def _logreg_kernel(w_ref, b_ref, x_ref, o_ref):
    # w_ref / b_ref: (1,) scalars in SMEM.  x_ref / o_ref: (TILE_R, 128) VMEM tiles.
    w = w_ref[0]
    b = b_ref[0]
    z = x_ref[...] * w + b                         # Linear(1,1): x * W + b (VPU)
    # sigmoid(z) = 0.5 * tanh(0.5 * z) + 0.5  -> single EUP op, numerically stable.
    o_ref[...] = 0.5 * jnp.tanh(0.5 * z) + 0.5


def _choose_tile_r(rows, tile_rows):
    """Row-tile (sublane) count: as close to `tile_rows` (~1 MiB f32 blocks at
    128 lanes) as possible, but keep >= ~4 grid steps when the input is large
    enough (both v7x TensorCores busy + pipeline overlap); multiple of 8."""
    target = min(int(tile_rows), max(8, -(-rows // 4)))
    tile_r = max(8, (target // 8) * 8)
    rows_r8 = ((rows + 7) // 8) * 8
    return min(tile_r, rows_r8)


@partial(jax.jit, static_argnames=("tile_rows",))
def logistic_regression(x, weight, bias, *, tile_rows=2048):
    """x: (N, 1) f32; weight: (1, 1) f32; bias: (1,) f32 -> (N, 1) f32."""
    n, f = x.shape
    assert f == 1 and weight.shape == (1, 1) and bias.shape == (1,)

    # --- lane-dense view: (N, 1) -> (rows, 128) ---
    rows = -(-n // _LANE)                              # ceil(N / 128)
    x_flat = x.reshape(-1)
    needs_pad = (n % _LANE) != 0
    if needs_pad:
        # Only the sub-128 tail is padded; common N % 128 == 0 case pays nothing.
        x_slab = jnp.pad(x_flat, (0, rows * _LANE - n)).reshape(rows, _LANE)
    else:
        x_slab = x_flat.reshape(rows, _LANE)           # free view, no HBM copy

    tile_r = _choose_tile_r(rows, tile_rows)
    grid = (pl.cdiv(rows, tile_r),)                    # ragged last block OK

    out = pl.pallas_call(
        _logreg_kernel,
        out_shape=jax.ShapeDtypeStruct((rows, _LANE), x.dtype),
        grid=grid,
        in_specs=[
            pl.BlockSpec(memory_space=pltpu.MemorySpace.SMEM),   # weight scalar
            pl.BlockSpec(memory_space=pltpu.MemorySpace.SMEM),   # bias scalar
            pl.BlockSpec((tile_r, _LANE), lambda i: (i, 0)),     # x tile
        ],
        out_specs=pl.BlockSpec((tile_r, _LANE), lambda i: (i, 0)),
        compiler_params=pltpu.CompilerParams(
            dimension_semantics=("parallel",),   # megacore on v7x; no-op on v5e/v6e
        ),
    )(weight.reshape((1,)), bias.reshape((1,)), x_slab)

    # --- unpack back to the module's (N, 1) layout ---
    y_flat = out.reshape(-1)
    if needs_pad:
        y_flat = y_flat[:n]
    return y_flat.reshape(n, f)


if __name__ == "__main__":
    key = jax.random.PRNGKey(0)
    kx, kw, kb = jax.random.split(key, 3)

    # Deterministic parameter init (PyTorch default for fan_in=1: U(-1, 1)).
    weight = jax.random.uniform(kw, (1, 1), dtype=jnp.float32, minval=-1.0, maxval=1.0)
    bias = jax.random.uniform(kb, (1,), dtype=jnp.float32, minval=-1.0, maxval=1.0)

    # Fast path: N % 128 == 0 -> zero wrapper copies; rows=20, tile_r=8 ->
    # 3-step grid with a ragged last block (exercises edge-block masking).
    n = 2560
    x = jax.random.normal(kx, (n, 1), dtype=jnp.float32)
    y = logistic_regression(x, weight, bias)
    jax.block_until_ready(y)
    y_ref = jax.nn.sigmoid(x @ weight.T + bias)
    assert y.shape == (n, 1)
    assert jnp.allclose(y, y_ref, atol=1e-5, rtol=1e-5)

    # Ragged-N path: N not a multiple of 128 (tail padded, then sliced off).
    n2 = 1000
    x2 = jax.random.normal(kx, (n2, 1), dtype=jnp.float32)
    y2 = logistic_regression(x2, weight, bias)
    jax.block_until_ready(y2)
    y2_ref = jax.nn.sigmoid(x2 @ weight.T + bias)
    assert y2.shape == (n2, 1)
    assert jnp.allclose(y2, y2_ref, atol=1e-5, rtol=1e-5)

    print("KERNEL_OK")
</pallas_src>

<mosaic_0001>
module attributes {stable_mosaic.version = 11 : i64} {
  func.func @_logreg_kernel(%arg0: i32, %arg1: memref<1xf32, #tpu.memory_space<smem>>, %arg2: memref<1xf32, #tpu.memory_space<smem>>, %arg3: memref<8x128xf32, #tpu.memory_space<vmem>>, %arg4: memref<8x128xf32, #tpu.memory_space<vmem>>) attributes {dimension_semantics = [#tpu.dimension_semantics<parallel>], iteration_bounds = array<i64: 3>, scalar_prefetch = 0 : i64, scratch_operands = 0 : i64, tpu.core_type = #tpu.core_type<tc>, window_params = [{transform_indices = @transform_0, window_bounds = array<i64: 1>}, {transform_indices = @transform_1, window_bounds = array<i64: 1>}, {transform_indices = @transform_2, window_bounds = array<i64: 8, 128>}, {transform_indices = @transform_3, window_bounds = array<i64: 8, 128>}]} {
    %c0 = arith.constant 0 : index
    %0 = memref.load %arg1[%c0] : memref<1xf32, #tpu.memory_space<smem>>
    %c0_0 = arith.constant 0 : index
    %1 = memref.load %arg2[%c0_0] : memref<1xf32, #tpu.memory_space<smem>>
    %c0_1 = arith.constant 0 : index
    %c0_2 = arith.constant 0 : index
    %2 = vector.load %arg3[%c0_1, %c0_2] : memref<8x128xf32, #tpu.memory_space<vmem>>, vector<8x128xf32>
    %3 = vector.broadcast %0 : f32 to vector<8x128xf32>
    %4 = arith.mulf %2, %3 : vector<8x128xf32>
    %5 = vector.broadcast %1 : f32 to vector<8x128xf32>
    %6 = arith.addf %4, %5 : vector<8x128xf32>
    %cst = arith.constant 5.000000e-01 : f32
    %7 = vector.broadcast %cst : f32 to vector<8x128xf32>
    %8 = arith.mulf %7, %6 : vector<8x128xf32>
    %9 = math.tanh %8 : vector<8x128xf32>
    %cst_3 = arith.constant 5.000000e-01 : f32
    %10 = vector.broadcast %cst_3 : f32 to vector<8x128xf32>
    %11 = arith.mulf %10, %9 : vector<8x128xf32>
    %cst_4 = arith.constant 5.000000e-01 : f32
    %12 = vector.broadcast %cst_4 : f32 to vector<8x128xf32>
    %13 = arith.addf %11, %12 : vector<8x128xf32>
    %c0_5 = arith.constant 0 : index
    %c0_6 = arith.constant 0 : index
    %14 = vector.load %arg4[%c0_5, %c0_6] : memref<8x128xf32, #tpu.memory_space<vmem>>, vector<8x128xf32>
    tpu.vector_store %arg4[%c0_5, %c0_6], %13 {strides = array<i32>} : memref<8x128xf32, #tpu.memory_space<vmem>>, vector<8x128xf32>,
    return
  }
  func.func @transform_0(%arg0: i32) -> i32 {
    %c0_i32 = arith.constant 0 : i32
    %c0_i32_0 = arith.constant 0 : i32
    return %c0_i32 : i32
  }
  func.func @transform_1(%arg0: i32) -> i32 {
    %c0_i32 = arith.constant 0 : i32
    %c0_i32_0 = arith.constant 0 : i32
    return %c0_i32 : i32
  }
  func.func @transform_2(%arg0: i32) -> (i32, i32) {
    %c0_i32 = arith.constant 0 : i32
    %c0_i32_0 = arith.constant 0 : i32
    return %arg0, %c0_i32 : i32, i32
  }
  func.func @transform_3(%arg0: i32) -> (i32, i32) {
    %c0_i32 = arith.constant 0 : i32
    %c0_i32_0 = arith.constant 0 : i32
    return %arg0, %c0_i32 : i32, i32
  }
}

</mosaic_0001>

<bundles_post_ra>
// kernel: logistic_regression.1
= control target key start
LH: loop header
LB: loop body
LE: loop exit
PB: predicated region body
PF: predicated region fallthrough
CT: control target
= control target key end

     0   :  { %s286_s16 = smov 0   ;;  %s297_s0 = inlined_call_operand.<no memory space> [shape: f32[1], index: 0, kind: input, shape index: {}]   ;;  %s298_s1 = inlined_call_operand.<no memory space> [shape: f32[1], index: 1, kind: input, shape index: {}]   ;;  %s299_s2 = inlined_call_operand.vmem [shape: f32[20,128], index: 2, kind: input, shape index: {}]   ;;  %s300_s3 = inlined_call_operand.vmem [shape: f32[20,128], index: 3, kind: output, shape index: {}]  }
   0x1   :  { %8 = sst [smem:[#allocation2]] %s297_s0 }
   0x2   :  { %9 = sst [smem:[#allocation3]] %s298_s1 }
   0x3 LB: > { %s233_s17 = sadd.s32 4294967295, %s258_s16   ;;  %p237_p0 = scmp.ge.s32.totalorder %s258_s16, 1  ;;  %s258_s16 = sphi %s286_s16, %s15_s16  }
   0x4   : > { %p138_p1 = scmp.lt.s32.totalorder %s258_s16, 4 }
   0x6   : > { %p139_p2 = pnand %p237_p0, %p138_p1 }
   0x7   : > { %p160_p3 = scmp.lt.s32.totalorder (!%p139_p2), %s233_s17, 2  ;;  %s168_s18 = sld [smem:[#allocation2]] (!%p139_p2) }
   0x8   : > { %142 = sbr.rel (%p139_p2) target bundleno = 42 (0x2a), region = 32  ;;  %s169_s19 = sld [smem:[#allocation3]] (!%p139_p2) }
   0xd   : > { %s302_s17 = smov (!%p160_p3, %s233_s17), 2  ;;  %v171_v1 = vstv %s168_s18 }
   0xe   : > { %s238_s0 = sshll.u32 %s302_s17, 3  ;;  %v173_v3 = vstv %s169_s19 }
   0xf   : > { %s163_s1 = scalar_lea.vmem %s299_s2, %s238_s0  ;;  %s167_s24 = scalar_lea.vmem %s300_s3, %s238_s0 }
  0x10   : > { %v170_v0 = vld [vmem:[%s163_s1] sm:$0xff] }
  0x11   : > { %v172_v2 = vmul.f32 %v171_v1, %v170_v0 }
  0x13   : > { %v174_v4 = vadd.f32 %v173_v3, %v172_v2 }
  0x15   : > { %v175_v5 = vmul.f32 0.5, %v174_v4 }
  0x17   : > { %250 = vtanh.f32 %v175_v5 }
  0x24   : > { %v251_v6 = vpop.eup %250 }
  0x25   : > { %v177_v7 = vmul.f32 0.5, %v251_v6 }
  0x27   : > { %v178_v8 = vadd.f32 0.5, %v177_v7 }
  0x29   : > { %179 = vst [vmem:[%s167_s24] sm:$0xff] %v178_v8 }
  0x2a PF: > { %s15_s16 = sadd.s32 1, %s258_s16  }
  0x2b   : > { %p12_p4 = scmp.ge.s32.totalorder %s15_s16, 5  }
  0x2d   :  { %14 = sbr.rel (!%p12_p4) target bundleno = 3 (0x3), region = 62 }

</bundles_post_ra>
